<compile_context>
chip_gen: v6e
topology: v6e:2x2x1
jax: 0.10.0
libtpu: 0.0.40
codegen_flags: <defaults>
</compile_context>

<pallas_src>
import numpy as np
import jax
import jax.numpy as jnp
from jax import lax
from jax.experimental import pallas as pl
from jax.experimental.pallas import tpu as pltpu


# ----------------------------- Pallas kernel --------------------------------

def _generator_kernel(x_ref, wS_ref, bS_ref, wB_ref, bB_ref, aB_ref,
                      wT_ref, bT_ref, o_ref):
    """One grid step = one batch element; the whole forward stays in vregs/VMEM."""
    H = x_ref.shape[1]
    WF = x_ref.shape[2]            # W * num_feat   (lane width of activations)
    OUT = o_ref.shape[2]           # padded tail lane width (multiple of 128)
    nb = wB_ref.shape[0]           # number of backbone blocks (static)

    def conv3(a, w, b, n_out):
        """3x3 'SAME' conv of activation `a` (H, WF) as ONE fused MXU matmul.

        `w` is (WF, 3*n_out): the three n_out-wide column blocks are the dy=0/1/2
        kernel rows (dx taps + channel contraction pre-folded into a banded
        matrix).  dy=0 (top) / dy=2 (bottom) contributions are shifted by +/-1
        output row with XLU sublane rolls; the wrapped halo row is masked off.
        """
        t = jnp.dot(a.astype(jnp.bfloat16), w,
                    preferred_element_type=jnp.float32)          # (H, 3*n_out) f32
        rows = lax.broadcasted_iota(jnp.int32, (H, n_out), 0)
        top = pltpu.roll(t[:, :n_out], 1, axis=0)                # in row h -> out row h+1
        bot = pltpu.roll(t[:, 2 * n_out:], H - 1, axis=0)        # in row h -> out row h-1
        out = t[:, n_out:2 * n_out] + b                          # dy=1 (center) + bias
        out = out + jnp.where(rows > 0, top, 0.0)                # zero wrapped row 0
        out = out + jnp.where(rows < H - 1, bot, 0.0)            # zero wrapped row H-1
        return out

    a = x_ref[0]                                                 # (H, WF) channel-padded
    feat = conv3(a, wS_ref[...], bS_ref[...], WF)                # shallow conv (linear)
    a = feat
    for i in range(nb):                                          # statically unrolled
        z = conv3(a, wB_ref[i], bB_ref[i], WF)                   # reparameterized ECB conv
        a = jnp.where(z > 0, z, z * aB_ref[i])                   # PReLU (per-channel alpha)
    a = a + feat                                                 # long residual
    # tail conv (linear): columns pre-permuted for PixelShuffle, padded to OUT lanes.
    o_ref[0] = conv3(a, wT_ref[...], bT_ref[...], OUT)


# ------------------------ one-time parameter preparation ---------------------

def _fused_band(w_hwio, W, f_in, col_perm=None, n_out=None):
    """Expand a 3x3 HWIO conv weight into a fused (W*f_in, 3*n_out) band matrix.

    Column block dy maps a full activation row (W pixels x f_in channels) to the
    dy-th kernel-row contribution of a full output row.  Input channels < f_in
    are zero padded; left/right spatial zero-padding columns contribute nothing
    and are dropped.  Optionally permutes / zero-pads the output columns.
    """
    w = np.asarray(w_hwio, np.float32)                      # (3, 3, cin, cout)
    kh, kw, cin, cout = w.shape
    wp = np.zeros((kh, kw, f_in, cout), np.float32)
    wp[:, :, :cin, :] = w
    eye = np.eye(W, dtype=np.float32)
    n_cols = W * cout
    bands = []
    for dy in range(kh):
        m = np.zeros(((W + 2) * f_in, n_cols), np.float32)
        for dx in range(kw):
            m[dx * f_in:dx * f_in + W * f_in, :] += np.kron(eye, wp[dy, dx])
        band = m[f_in:f_in + W * f_in, :]                   # drop always-zero halo cols
        if col_perm is not None:
            band = band[:, col_perm]
        if n_out is not None and n_out > band.shape[1]:
            band = np.pad(band, ((0, 0), (0, n_out - band.shape[1])))
        bands.append(band)
    return np.concatenate(bands, axis=1)                    # (W*f_in, 3*n_out)


def _pixel_shuffle_perm(W, colors, r):
    """Column permutation folding nn.PixelShuffle(r) into the tail conv's lanes."""
    Ct = colors * r * r
    perm = np.empty(W * Ct, np.int32)
    p = 0
    for i in range(r):
        for w in range(W):
            for j in range(r):
                for c in range(colors):
                    perm[p] = w * Ct + (c * r * r + i * r + j)
                    p += 1
    return perm


def prepare_generator_params(params, W, scale, colors):
    """Host-side, one-time prep of band matrices (bf16) and tiled biases (f32)."""
    wS, bS = params['shallow']
    F = wS.shape[-1]
    Ct = colors * scale * scale
    out_lanes = max(128, ((W * Ct + 127) // 128) * 128)     # lane-clean tail width
    perm = _pixel_shuffle_perm(W, colors, scale)

    def tile_bias(b):
        return np.tile(np.asarray(b, np.float32), W)[None, :]

    wT, bT = params['tail']
    bT_cols = np.tile(np.asarray(bT, np.float32), W)[perm]
    bT_cols = np.pad(bT_cols, (0, out_lanes - bT_cols.shape[0]))[None, :]

    prep = dict(
        wS=jnp.asarray(_fused_band(wS, W, F), jnp.bfloat16),
        bS=jnp.asarray(tile_bias(bS)),
        wB=jnp.asarray(np.stack([_fused_band(w, W, F)
                                 for (w, _, _) in params['backbone']]), jnp.bfloat16),
        bB=jnp.asarray(np.stack([tile_bias(b) for (_, b, _) in params['backbone']])),
        aB=jnp.asarray(np.stack([tile_bias(a) for (_, _, a) in params['backbone']])),
        wT=jnp.asarray(_fused_band(wT, W, F, col_perm=perm, n_out=out_lanes),
                       jnp.bfloat16),
        bT=jnp.asarray(bT_cols),
        F=F, Ct=Ct, out_lanes=out_lanes,
    )
    return prep


# ------------------------------- forward wrapper ------------------------------

def generator_forward(x_nchw, prep, scale, colors):
    N, _, H, W = x_nchw.shape
    F, Ct, OUTL = prep['F'], prep['Ct'], prep['out_lanes']

    # Tiny XLA layout glue: NCHW -> lane-dense (H, W*F) slab with channel padding.
    x_nhwc = jnp.transpose(x_nchw, (0, 2, 3, 1)).astype(jnp.float32)
    x_cpad = jnp.zeros((N, H, W, F), jnp.float32).at[..., :colors].set(x_nhwc)
    x2d = x_cpad.reshape(N, H, W * F)

    out2d = pl.pallas_call(
        _generator_kernel,
        out_shape=jax.ShapeDtypeStruct((N, H, OUTL), jnp.float32),
        grid=(N,),
        in_specs=[
            pl.BlockSpec((1, H, W * F), lambda n: (n, 0, 0)),          # input slab
            pl.BlockSpec(prep['wS'].shape, lambda n: (0, 0)),          # shallow W (fused dy)
            pl.BlockSpec(prep['bS'].shape, lambda n: (0, 0)),          # shallow b
            pl.BlockSpec(prep['wB'].shape, lambda n: (0, 0, 0)),       # backbone W
            pl.BlockSpec(prep['bB'].shape, lambda n: (0, 0, 0)),       # backbone b
            pl.BlockSpec(prep['aB'].shape, lambda n: (0, 0, 0)),       # backbone PReLU alpha
            pl.BlockSpec(prep['wT'].shape, lambda n: (0, 0)),          # tail W (shuffled cols)
            pl.BlockSpec(prep['bT'].shape, lambda n: (0, 0)),          # tail b
        ],
        out_specs=pl.BlockSpec((1, H, OUTL), lambda n: (n, 0, 0)),
        compiler_params=pltpu.CompilerParams(dimension_semantics=("parallel",)),
    )(x2d, prep['wS'], prep['bS'], prep['wB'], prep['bB'], prep['aB'],
      prep['wT'], prep['bT'])

    # PixelShuffle already folded into the tail column order: just slice off the
    # lane padding, reshape, and go back to NCHW.
    y = out2d[:, :, :W * Ct].reshape(N, H * scale, W * scale, colors)
    return jnp.transpose(y, (0, 3, 1, 2))


# ----------------------------- params / reference ----------------------------

def init_params(key, num_block, num_feat, colors, scale):
    def conv_init(k, cin, cout):
        k1, k2 = jax.random.split(k)
        w = jax.random.normal(k1, (cout, cin, 3, 3), jnp.float32) * 0.1   # OIHW
        b = jax.random.normal(k2, (cout,), jnp.float32) * 0.05
        return jnp.transpose(w, (2, 3, 1, 0)), b                          # -> HWIO

    keys = jax.random.split(key, num_block + 2)
    params = {'shallow': conv_init(keys[0], colors, num_feat), 'backbone': []}
    for i in range(num_block):
        w, b = conv_init(keys[1 + i], num_feat, num_feat)
        alpha = jnp.full((num_feat,), 0.25, jnp.float32)          # nn.PReLU default slope
        params['backbone'].append((w, b, alpha))
    params['tail'] = conv_init(keys[-1], num_feat, colors * scale * scale)
    return params


def _ref_conv(x, w, b):
    y = lax.conv_general_dilated(x, w, (1, 1), 'SAME',
                                 dimension_numbers=('NHWC', 'HWIO', 'NHWC'),
                                 precision=lax.Precision.HIGHEST)
    return y + b


def pixel_shuffle_nhwc(x, r):
    N, H, W, C = x.shape
    c = C // (r * r)
    x = x.reshape(N, H, W, c, r, r)
    x = x.transpose(0, 1, 4, 2, 5, 3)
    return x.reshape(N, H * r, W * r, c)


def generator_reference(x_nchw, params, scale):
    x = jnp.transpose(x_nchw, (0, 2, 3, 1))
    wS, bS = params['shallow']
    feat = _ref_conv(x, wS, bS)
    y = feat
    for (w, b, a) in params['backbone']:
        z = _ref_conv(y, w, b)
        y = jnp.where(z > 0, z, z * a)
    y = y + feat
    wT, bT = params['tail']
    y = _ref_conv(y, wT, bT)
    y = pixel_shuffle_nhwc(y, scale)
    return jnp.transpose(y, (0, 3, 1, 2))


if __name__ == "__main__":
    # cfg: num_block=2, num_feat=8, scale=2, n_colors=3, act_type='prelu'
    num_block, num_feat, scale, colors = 2, 8, 2, 3
    H = W = 16                                            # W * num_feat = 128 lanes
    key = jax.random.PRNGKey(0)
    kx, kp = jax.random.split(key)
    x = jax.random.normal(kx, (2, colors, H, W), jnp.float32)   # NCHW, like PyTorch

    params = init_params(kp, num_block, num_feat, colors, scale)
    prep = prepare_generator_params(params, W, scale, colors)   # one-time host prep

    fwd = jax.jit(lambda inp: generator_forward(inp, prep, scale, colors))
    out = jax.block_until_ready(fwd(x))
    ref = jax.block_until_ready(generator_reference(x, params, scale))

    assert out.shape == (2, colors, H * scale, W * scale), out.shape
    err = float(jnp.max(jnp.abs(out - ref)))
    # bf16 MXU operands (per perf review) -> relaxed tolerance vs the f32 reference.
    assert jnp.allclose(out, ref, atol=5e-2, rtol=5e-2), f"max abs err {err}"
    print("KERNEL_OK")
</pallas_src>

<mosaic_0001>
module attributes {stable_mosaic.version = 11 : i64} {
  func.func @_generator_kernel(%arg0: i32, %arg1: memref<1x16x128xf32, #tpu.memory_space<vmem>>, %arg2: memref<128x384xbf16, #tpu.memory_space<vmem>>, %arg3: memref<1x128xf32, #tpu.memory_space<vmem>>, %arg4: memref<2x128x384xbf16, #tpu.memory_space<vmem>>, %arg5: memref<2x1x128xf32, #tpu.memory_space<vmem>>, %arg6: memref<2x1x128xf32, #tpu.memory_space<vmem>>, %arg7: memref<128x768xbf16, #tpu.memory_space<vmem>>, %arg8: memref<1x256xf32, #tpu.memory_space<vmem>>, %arg9: memref<1x16x256xf32, #tpu.memory_space<vmem>>) attributes {dimension_semantics = [#tpu.dimension_semantics<parallel>], iteration_bounds = array<i64: 2>, scalar_prefetch = 0 : i64, scratch_operands = 0 : i64, tpu.core_type = #tpu.core_type<tc>, window_params = [{transform_indices = @transform_0, window_bounds = array<i64: 1, 16, 128>}, {pipeline_mode = #tpu.pipeline_mode<synchronous>, transform_indices = @transform_1, window_bounds = array<i64: 128, 384>}, {pipeline_mode = #tpu.pipeline_mode<synchronous>, transform_indices = @transform_2, window_bounds = array<i64: 1, 128>}, {pipeline_mode = #tpu.pipeline_mode<synchronous>, transform_indices = @transform_3, window_bounds = array<i64: 2, 128, 384>}, {pipeline_mode = #tpu.pipeline_mode<synchronous>, transform_indices = @transform_4, window_bounds = array<i64: 2, 1, 128>}, {pipeline_mode = #tpu.pipeline_mode<synchronous>, transform_indices = @transform_5, window_bounds = array<i64: 2, 1, 128>}, {pipeline_mode = #tpu.pipeline_mode<synchronous>, transform_indices = @transform_6, window_bounds = array<i64: 128, 768>}, {pipeline_mode = #tpu.pipeline_mode<synchronous>, transform_indices = @transform_7, window_bounds = array<i64: 1, 256>}, {transform_indices = @transform_8, window_bounds = array<i64: 1, 16, 256>}]} {
    %c0 = arith.constant 0 : index
    %c0_0 = arith.constant 0 : index
    %c0_1 = arith.constant 0 : index
    %0 = vector.load %arg1[%c0, %c0_0, %c0_1] : memref<1x16x128xf32, #tpu.memory_space<vmem>>, vector<1x16x128xf32>
    %1 = vector.shape_cast %0 : vector<1x16x128xf32> to vector<16x128xf32>
    %c0_2 = arith.constant 0 : index
    %c0_3 = arith.constant 0 : index
    %2 = vector.load %arg2[%c0_2, %c0_3] : memref<128x384xbf16, #tpu.memory_space<vmem>>, vector<128x384xbf16>
    %c0_4 = arith.constant 0 : index
    %c0_5 = arith.constant 0 : index
    %3 = vector.load %arg3[%c0_4, %c0_5] : memref<1x128xf32, #tpu.memory_space<vmem>>, vector<1x128xf32>
    %4 = arith.truncf %1 : vector<16x128xf32> to vector<16x128xbf16>
    %cst = arith.constant dense<0.000000e+00> : vector<16x384xf32>
    %5 = tpu.matmul %4, %2, %cst {dimension_numbers = #tpu.dot_dimension_numbers<[1], [0], [0], [1], [0, 0, 1, 1], [], []>} : vector<16x128xbf16>, vector<128x384xbf16>, vector<16x384xf32> -> vector<16x384xf32>
    %6 = tpu.iota {dimensions = array<i32: 0>} : vector<16x128xi32>
    %7 = vector.extract_strided_slice %5 {offsets = [0, 0], sizes = [16, 128], strides = [1, 1]} : vector<16x384xf32> to vector<16x128xf32>
    %c1_i32 = arith.constant 1 : i32
    %8 = tpu.dynamic_rotate %7 by %c1_i32 dim 0 : vector<16x128xf32>, i32 -> vector<16x128xf32>
    %9 = vector.extract_strided_slice %5 {offsets = [0, 256], sizes = [16, 128], strides = [1, 1]} : vector<16x384xf32> to vector<16x128xf32>
    %c15_i32 = arith.constant 15 : i32
    %10 = tpu.dynamic_rotate %9 by %c15_i32 dim 0 : vector<16x128xf32>, i32 -> vector<16x128xf32>
    %11 = vector.extract_strided_slice %5 {offsets = [0, 128], sizes = [16, 128], strides = [1, 1]} : vector<16x384xf32> to vector<16x128xf32>
    %12 = vector.broadcast %3 : vector<1x128xf32> to vector<16x128xf32>
    %13 = arith.addf %11, %12 : vector<16x128xf32>
    %c0_i32 = arith.constant 0 : i32
    %14 = vector.broadcast %c0_i32 : i32 to vector<16x128xi32>
    %15 = arith.cmpi sgt, %6, %14 : vector<16x128xi32>
    %cst_6 = arith.constant 0.000000e+00 : f32
    %16 = vector.broadcast %cst_6 : f32 to vector<16x128xf32>
    %17 = arith.select %15, %8, %16 : vector<16x128xi1>, vector<16x128xf32>
    %18 = arith.addf %13, %17 : vector<16x128xf32>
    %c15_i32_7 = arith.constant 15 : i32
    %19 = vector.broadcast %c15_i32_7 : i32 to vector<16x128xi32>
    %20 = arith.cmpi slt, %6, %19 : vector<16x128xi32>
    %cst_8 = arith.constant 0.000000e+00 : f32
    %21 = vector.broadcast %cst_8 : f32 to vector<16x128xf32>
    %22 = arith.select %20, %10, %21 : vector<16x128xi1>, vector<16x128xf32>
    %23 = arith.addf %18, %22 : vector<16x128xf32>
    %c0_9 = arith.constant 0 : index
    %c0_10 = arith.constant 0 : index
    %c0_11 = arith.constant 0 : index
    %24 = vector.load %arg4[%c0_9, %c0_10, %c0_11] : memref<2x128x384xbf16, #tpu.memory_space<vmem>>, vector<1x128x384xbf16>
    %25 = vector.shape_cast %24 : vector<1x128x384xbf16> to vector<128x384xbf16>
    %c0_12 = arith.constant 0 : index
    %c0_13 = arith.constant 0 : index
    %c0_14 = arith.constant 0 : index
    %26 = vector.load %arg5[%c0_12, %c0_13, %c0_14] : memref<2x1x128xf32, #tpu.memory_space<vmem>>, vector<1x1x128xf32>
    %27 = vector.shape_cast %26 : vector<1x1x128xf32> to vector<1x128xf32>
    %28 = arith.truncf %23 : vector<16x128xf32> to vector<16x128xbf16>
    %cst_15 = arith.constant dense<0.000000e+00> : vector<16x384xf32>
    %29 = tpu.matmul %28, %25, %cst_15 {dimension_numbers = #tpu.dot_dimension_numbers<[1], [0], [0], [1], [0, 0, 1, 1], [], []>} : vector<16x128xbf16>, vector<128x384xbf16>, vector<16x384xf32> -> vector<16x384xf32>
    %30 = tpu.iota {dimensions = array<i32: 0>} : vector<16x128xi32>
    %31 = vector.extract_strided_slice %29 {offsets = [0, 0], sizes = [16, 128], strides = [1, 1]} : vector<16x384xf32> to vector<16x128xf32>
    %c1_i32_16 = arith.constant 1 : i32
    %32 = tpu.dynamic_rotate %31 by %c1_i32_16 dim 0 : vector<16x128xf32>, i32 -> vector<16x128xf32>
    %33 = vector.extract_strided_slice %29 {offsets = [0, 256], sizes = [16, 128], strides = [1, 1]} : vector<16x384xf32> to vector<16x128xf32>
    %c15_i32_17 = arith.constant 15 : i32
    %34 = tpu.dynamic_rotate %33 by %c15_i32_17 dim 0 : vector<16x128xf32>, i32 -> vector<16x128xf32>
    %35 = vector.extract_strided_slice %29 {offsets = [0, 128], sizes = [16, 128], strides = [1, 1]} : vector<16x384xf32> to vector<16x128xf32>
    %36 = vector.broadcast %27 : vector<1x128xf32> to vector<16x128xf32>
    %37 = arith.addf %35, %36 : vector<16x128xf32>
    %c0_i32_18 = arith.constant 0 : i32
    %38 = vector.broadcast %c0_i32_18 : i32 to vector<16x128xi32>
    %39 = arith.cmpi sgt, %30, %38 : vector<16x128xi32>
    %cst_19 = arith.constant 0.000000e+00 : f32
    %40 = vector.broadcast %cst_19 : f32 to vector<16x128xf32>
    %41 = arith.select %39, %32, %40 : vector<16x128xi1>, vector<16x128xf32>
    %42 = arith.addf %37, %41 : vector<16x128xf32>
    %c15_i32_20 = arith.constant 15 : i32
    %43 = vector.broadcast %c15_i32_20 : i32 to vector<16x128xi32>
    %44 = arith.cmpi slt, %30, %43 : vector<16x128xi32>
    %cst_21 = arith.constant 0.000000e+00 : f32
    %45 = vector.broadcast %cst_21 : f32 to vector<16x128xf32>
    %46 = arith.select %44, %34, %45 : vector<16x128xi1>, vector<16x128xf32>
    %47 = arith.addf %42, %46 : vector<16x128xf32>
    %cst_22 = arith.constant 0.000000e+00 : f32
    %48 = vector.broadcast %cst_22 : f32 to vector<16x128xf32>
    %49 = arith.cmpf ogt, %47, %48 : vector<16x128xf32>
    %c0_23 = arith.constant 0 : index
    %c0_24 = arith.constant 0 : index
    %c0_25 = arith.constant 0 : index
    %50 = vector.load %arg6[%c0_23, %c0_24, %c0_25] : memref<2x1x128xf32, #tpu.memory_space<vmem>>, vector<1x1x128xf32>
    %51 = vector.shape_cast %50 : vector<1x1x128xf32> to vector<1x128xf32>
    %52 = vector.broadcast %51 : vector<1x128xf32> to vector<16x128xf32>
    %53 = arith.mulf %47, %52 : vector<16x128xf32>
    %54 = arith.select %49, %47, %53 : vector<16x128xi1>, vector<16x128xf32>
    %c1 = arith.constant 1 : index
    %c0_26 = arith.constant 0 : index
    %c0_27 = arith.constant 0 : index
    %55 = vector.load %arg4[%c1, %c0_26, %c0_27] : memref<2x128x384xbf16, #tpu.memory_space<vmem>>, vector<1x128x384xbf16>
    %56 = vector.shape_cast %55 : vector<1x128x384xbf16> to vector<128x384xbf16>
    %c1_28 = arith.constant 1 : index
    %c0_29 = arith.constant 0 : index
    %c0_30 = arith.constant 0 : index
    %57 = vector.load %arg5[%c1_28, %c0_29, %c0_30] : memref<2x1x128xf32, #tpu.memory_space<vmem>>, vector<1x1x128xf32>
    %58 = vector.shape_cast %57 : vector<1x1x128xf32> to vector<1x128xf32>
    %59 = arith.truncf %54 : vector<16x128xf32> to vector<16x128xbf16>
    %cst_31 = arith.constant dense<0.000000e+00> : vector<16x384xf32>
    %60 = tpu.matmul %59, %56, %cst_31 {dimension_numbers = #tpu.dot_dimension_numbers<[1], [0], [0], [1], [0, 0, 1, 1], [], []>} : vector<16x128xbf16>, vector<128x384xbf16>, vector<16x384xf32> -> vector<16x384xf32>
    %61 = tpu.iota {dimensions = array<i32: 0>} : vector<16x128xi32>
    %62 = vector.extract_strided_slice %60 {offsets = [0, 0], sizes = [16, 128], strides = [1, 1]} : vector<16x384xf32> to vector<16x128xf32>
    %c1_i32_32 = arith.constant 1 : i32
    %63 = tpu.dynamic_rotate %62 by %c1_i32_32 dim 0 : vector<16x128xf32>, i32 -> vector<16x128xf32>
    %64 = vector.extract_strided_slice %60 {offsets = [0, 256], sizes = [16, 128], strides = [1, 1]} : vector<16x384xf32> to vector<16x128xf32>
    %c15_i32_33 = arith.constant 15 : i32
    %65 = tpu.dynamic_rotate %64 by %c15_i32_33 dim 0 : vector<16x128xf32>, i32 -> vector<16x128xf32>
    %66 = vector.extract_strided_slice %60 {offsets = [0, 128], sizes = [16, 128], strides = [1, 1]} : vector<16x384xf32> to vector<16x128xf32>
    %67 = vector.broadcast %58 : vector<1x128xf32> to vector<16x128xf32>
    %68 = arith.addf %66, %67 : vector<16x128xf32>
    %c0_i32_34 = arith.constant 0 : i32
    %69 = vector.broadcast %c0_i32_34 : i32 to vector<16x128xi32>
    %70 = arith.cmpi sgt, %61, %69 : vector<16x128xi32>
    %cst_35 = arith.constant 0.000000e+00 : f32
    %71 = vector.broadcast %cst_35 : f32 to vector<16x128xf32>
    %72 = arith.select %70, %63, %71 : vector<16x128xi1>, vector<16x128xf32>
    %73 = arith.addf %68, %72 : vector<16x128xf32>
    %c15_i32_36 = arith.constant 15 : i32
    %74 = vector.broadcast %c15_i32_36 : i32 to vector<16x128xi32>
    %75 = arith.cmpi slt, %61, %74 : vector<16x128xi32>
    %cst_37 = arith.constant 0.000000e+00 : f32
    %76 = vector.broadcast %cst_37 : f32 to vector<16x128xf32>
    %77 = arith.select %75, %65, %76 : vector<16x128xi1>, vector<16x128xf32>
    %78 = arith.addf %73, %77 : vector<16x128xf32>
    %cst_38 = arith.constant 0.000000e+00 : f32
    %79 = vector.broadcast %cst_38 : f32 to vector<16x128xf32>
    %80 = arith.cmpf ogt, %78, %79 : vector<16x128xf32>
    %c1_39 = arith.constant 1 : index
    %c0_40 = arith.constant 0 : index
    %c0_41 = arith.constant 0 : index
    %81 = vector.load %arg6[%c1_39, %c0_40, %c0_41] : memref<2x1x128xf32, #tpu.memory_space<vmem>>, vector<1x1x128xf32>
    %82 = vector.shape_cast %81 : vector<1x1x128xf32> to vector<1x128xf32>
    %83 = vector.broadcast %82 : vector<1x128xf32> to vector<16x128xf32>
    %84 = arith.mulf %78, %83 : vector<16x128xf32>
    %85 = arith.select %80, %78, %84 : vector<16x128xi1>, vector<16x128xf32>
    %86 = arith.addf %85, %23 : vector<16x128xf32>
    %c0_42 = arith.constant 0 : index
    %c0_43 = arith.constant 0 : index
    %87 = vector.load %arg7[%c0_42, %c0_43] : memref<128x768xbf16, #tpu.memory_space<vmem>>, vector<128x768xbf16>
    %c0_44 = arith.constant 0 : index
    %c0_45 = arith.constant 0 : index
    %88 = vector.load %arg8[%c0_44, %c0_45] : memref<1x256xf32, #tpu.memory_space<vmem>>, vector<1x256xf32>
    %89 = arith.truncf %86 : vector<16x128xf32> to vector<16x128xbf16>
    %cst_46 = arith.constant dense<0.000000e+00> : vector<16x768xf32>
    %90 = tpu.matmul %89, %87, %cst_46 {dimension_numbers = #tpu.dot_dimension_numbers<[1], [0], [0], [1], [0, 0, 1, 1], [], []>} : vector<16x128xbf16>, vector<128x768xbf16>, vector<16x768xf32> -> vector<16x768xf32>
    %91 = tpu.iota {dimensions = array<i32: 0>} : vector<16x256xi32>
    %92 = vector.extract_strided_slice %90 {offsets = [0, 0], sizes = [16, 256], strides = [1, 1]} : vector<16x768xf32> to vector<16x256xf32>
    %c1_i32_47 = arith.constant 1 : i32
    %93 = tpu.dynamic_rotate %92 by %c1_i32_47 dim 0 : vector<16x256xf32>, i32 -> vector<16x256xf32>
    %94 = vector.extract_strided_slice %90 {offsets = [0, 512], sizes = [16, 256], strides = [1, 1]} : vector<16x768xf32> to vector<16x256xf32>
    %c15_i32_48 = arith.constant 15 : i32
    %95 = tpu.dynamic_rotate %94 by %c15_i32_48 dim 0 : vector<16x256xf32>, i32 -> vector<16x256xf32>
    %96 = vector.extract_strided_slice %90 {offsets = [0, 256], sizes = [16, 256], strides = [1, 1]} : vector<16x768xf32> to vector<16x256xf32>
    %97 = vector.broadcast %88 : vector<1x256xf32> to vector<16x256xf32>
    %98 = arith.addf %96, %97 : vector<16x256xf32>
    %c0_i32_49 = arith.constant 0 : i32
    %99 = vector.broadcast %c0_i32_49 : i32 to vector<16x256xi32>
    %100 = arith.cmpi sgt, %91, %99 : vector<16x256xi32>
    %cst_50 = arith.constant 0.000000e+00 : f32
    %101 = vector.broadcast %cst_50 : f32 to vector<16x256xf32>
    %102 = arith.select %100, %93, %101 : vector<16x256xi1>, vector<16x256xf32>
    %103 = arith.addf %98, %102 : vector<16x256xf32>
    %c15_i32_51 = arith.constant 15 : i32
    %104 = vector.broadcast %c15_i32_51 : i32 to vector<16x256xi32>
    %105 = arith.cmpi slt, %91, %104 : vector<16x256xi32>
    %cst_52 = arith.constant 0.000000e+00 : f32
    %106 = vector.broadcast %cst_52 : f32 to vector<16x256xf32>
    %107 = arith.select %105, %95, %106 : vector<16x256xi1>, vector<16x256xf32>
    %108 = arith.addf %103, %107 : vector<16x256xf32>
    %c0_53 = arith.constant 0 : index
    %c0_54 = arith.constant 0 : index
    %c0_55 = arith.constant 0 : index
    %109 = vector.load %arg9[%c0_53, %c0_54, %c0_55] : memref<1x16x256xf32, #tpu.memory_space<vmem>>, vector<1x16x256xf32>
    %110 = vector.shape_cast %109 : vector<1x16x256xf32> to vector<16x256xf32>
    %111 = vector.shape_cast %108 : vector<16x256xf32> to vector<1x16x256xf32>
    tpu.vector_store %arg9[%c0_53, %c0_54, %c0_55], %111 {strides = array<i32>} : memref<1x16x256xf32, #tpu.memory_space<vmem>>, vector<1x16x256xf32>,
    return
  }
  func.func @transform_0(%arg0: i32) -> (i32, i32, i32) {
    %c0_i32 = arith.constant 0 : i32
    %c0_i32_0 = arith.constant 0 : i32
    %c0_i32_1 = arith.constant 0 : i32
    return %arg0, %c0_i32, %c0_i32_0 : i32, i32, i32
  }
  func.func @transform_1(%arg0: i32) -> (i32, i32) {
    %c0_i32 = arith.constant 0 : i32
    %c0_i32_0 = arith.constant 0 : i32
    %c0_i32_1 = arith.constant 0 : i32
    return %c0_i32, %c0_i32_0 : i32, i32
  }
  func.func @transform_2(%arg0: i32) -> (i32, i32) {
    %c0_i32 = arith.constant 0 : i32
    %c0_i32_0 = arith.constant 0 : i32
    %c0_i32_1 = arith.constant 0 : i32
    return %c0_i32, %c0_i32_0 : i32, i32
  }
  func.func @transform_3(%arg0: i32) -> (i32, i32, i32) {
    %c0_i32 = arith.constant 0 : i32
    %c0_i32_0 = arith.constant 0 : i32
    %c0_i32_1 = arith.constant 0 : i32
    %c0_i32_2 = arith.constant 0 : i32
    return %c0_i32, %c0_i32_0, %c0_i32_1 : i32, i32, i32
  }
  func.func @transform_4(%arg0: i32) -> (i32, i32, i32) {
    %c0_i32 = arith.constant 0 : i32
    %c0_i32_0 = arith.constant 0 : i32
    %c0_i32_1 = arith.constant 0 : i32
    %c0_i32_2 = arith.constant 0 : i32
    return %c0_i32, %c0_i32_0, %c0_i32_1 : i32, i32, i32
  }
  func.func @transform_5(%arg0: i32) -> (i32, i32, i32) {
    %c0_i32 = arith.constant 0 : i32
    %c0_i32_0 = arith.constant 0 : i32
    %c0_i32_1 = arith.constant 0 : i32
    %c0_i32_2 = arith.constant 0 : i32
    return %c0_i32, %c0_i32_0, %c0_i32_1 : i32, i32, i32
  }
  func.func @transform_6(%arg0: i32) -> (i32, i32) {
    %c0_i32 = arith.constant 0 : i32
    %c0_i32_0 = arith.constant 0 : i32
    %c0_i32_1 = arith.constant 0 : i32
    return %c0_i32, %c0_i32_0 : i32, i32
  }
  func.func @transform_7(%arg0: i32) -> (i32, i32) {
    %c0_i32 = arith.constant 0 : i32
    %c0_i32_0 = arith.constant 0 : i32
    %c0_i32_1 = arith.constant 0 : i32
    return %c0_i32, %c0_i32_0 : i32, i32
  }
  func.func @transform_8(%arg0: i32) -> (i32, i32, i32) {
    %c0_i32 = arith.constant 0 : i32
    %c0_i32_0 = arith.constant 0 : i32
    %c0_i32_1 = arith.constant 0 : i32
    return %arg0, %c0_i32, %c0_i32_0 : i32, i32, i32
  }
}

</mosaic_0001>

<bundles_post_ra>
// kernel: _lambda_.1
= control target key start
LH: loop header
LB: loop body
LE: loop exit
PB: predicated region body
PF: predicated region fallthrough
CT: control target
= control target key end

     0   :  { %13 = vsyncpa [#allocation3], 0  ;;  %s2253_s27 = smov 0   ;;  %s2717_s0 = inlined_call_operand.vmem [shape: f32[2,16,128], index: 0, kind: input, shape index: {}]   ;;  %s2718_s1 = inlined_call_operand.hbm [shape: bf16[128,384], index: 1, kind: input, shape index: {}]   ;;  %s2719_s2 = inlined_call_operand.vmem [shape: f32[1,128], index: 2, kind: input, shape index: {}]   ;;  %s2720_s3 = inlined_call_operand.vmem [shape: bf16[2,128,384], index: 3, kind: input, shape index: {}]   ;;  %s2721_s4 = inlined_call_operand.vmem [shape: f32[2,1,128], index: 4, kind: input, shape index: {}]   ;;  %s2722_s5 = inlined_call_operand.vmem [shape: f32[2,1,128], index: 5, kind: input, shape index: {}]   ;;  %s2723_s6 = inlined_call_operand.vmem [shape: bf16[128,768], index: 6, kind: input, shape index: {}]   ;;  %s2724_s7 = inlined_call_operand.vmem [shape: f32[1,256], index: 7, kind: input, shape index: {}]   ;;  %s2725_s8 = inlined_call_operand.vmem [shape: f32[2,16,256], index: 8, kind: output, shape index: {}]  }
   0x1 LB: > { %s2259_s28 = sadd.s32 4294967295, %s2200_s27   ;;  %p1713_p0 = scmp.ge.s32.totalorder %s2200_s27, 1  ;;  %s2200_s27 = sphi %s2253_s27, %s19_s27  }
   0x2   : > { %p223_p1 = scmp.lt.s32.totalorder %s2200_s27, 3  ;;  %s2202_s29 = smov [#allocation2]  }
   0x3   : > { %s235_s30 = sshll.u32 %s2202_s29, 4  ;;  %p1980_p3 = scmp.eq.s32.totalorder %s2259_s28, 0  ;;  %s236_s30 = int_to_ptr.vmem [resolvable:$true] %s235_s30 }
   0x4   : > { %p2263_p2 = pnand %p1713_p0, %p223_p1  ;;  %s2175_s10 = scalar_lea.vmem %s236_s30, 3072 }
   0x5   : > { %p2176_p7 = scmp.ne.s32.totalorder %s236_s30, %s2175_s10  ;;  %p2183_p10 = scmp.lt.s32.totalorder %s236_s30, %s236_s30 }
   0x6   : > { %p1976_p4 = pneg %p2263_p2  ;;  %p2184_p11 = scmp.lt.s32.totalorder %s2175_s10, %s2175_s10 }
   0x8   : > { %p1977_p5 = pnand %p1980_p3, %p1976_p4  ;;  %p2185_p12 = por %p2184_p11, %p2183_p10 }
   0xa   : > { %p2166_p6 = pneg %p1977_p5 }
   0xc   : > { %p2178_p8 = pnand %p2176_p7, %p2166_p6 }
   0xe   : > { %p2179_p9 = pneg %p2178_p8 }
  0x10   : > { %p2186_p13 = pnand %p2185_p12, %p2179_p9 }
  0x12   : > { %2189 = shalt.err (!%p2186_p13)
}
  0x13   : > { %s2203_s11 = smov 192   ;;  %s2204_s12 = smov 12  }
  0x14   : > { %1979 = dma.hbm_to_vmem [thread:$0]  (!%p1977_p5), %s2718_s1, 3072, %s236_s30, [#allocation3], %s2203_s11, %s2203_s11, %s2204_s12  }
  0x15   : > { %277 = sbr.rel (%p2263_p2) target bundleno = 928 (0x3a0), region = 52 }
  0x1a   : > { %2195 = dma.done.wait (%p1980_p3), [#allocation3], 3072  }
  0x1b   : > { %2197 = vsyncadd (%p1980_p3), [#allocation3], 4294964224  ;;  %v2205_v0 = vmov 0.0   ;;  %vm2206_vm0 = vmmov 0   ;;  %v2207_v1 = vmov 0   ;;  %p311_p0 = scmp.lt.s32.totalorder %s2259_s28, 1  ;;  %v570_v54 = vlaneseq }
  0x1c   : > { %1912 = vmatprep.subr.bf16.mxu1 %v2205_v0  ;;  %1928 = vmatprep.mubr.msk.bf16.mxu1 %vm2206_vm0, %v2205_v0  ;;  %v1996_v2 = vld [vmem:[#allocation2 + $0xac] ss:$12 sps:$4 sm:$0xff]   ;;  %v1998_v3 = vld [vmem:[#allocation2 + $0xb0] ss:$12 sps:$4 sm:$0xff]   ;;  %v1999_v4 = vld [vmem:[#allocation2 + $0xa8] ss:$12 sps:$4 sm:$0xff]  }
  0x1d   : > { %518 = vmatprep.mubr.bf16.mxu0 %v2207_v1  ;;  %486 = vmatprep.subr.bf16.mxu0 %v1996_v2  ;;  %v2000_v5 = vld [vmem:[#allocation2 + $0x94] ss:$12 sps:$4 sm:$0xff]   ;;  %v2002_v6 = vld [vmem:[#allocation2 + $0x98] ss:$12 sps:$4 sm:$0xff]   ;;  %v2003_v7 = vld [vmem:[#allocation2 + $0x90] ss:$12 sps:$4 sm:$0xff]  }
  0x1e   : > { %1913 = vmatpush3.bf16.msra.mxu1 %v1998_v3  ;;  %487 = vmatpush1.bf16.msra.mxu0 %v1999_v4  ;;  %v2004_v8 = vld [vmem:[#allocation2 + $0x7c] ss:$12 sps:$4 sm:$0xff]   ;;  %v2006_v9 = vld [vmem:[#allocation2 + $0x80] ss:$12 sps:$4 sm:$0xff]   ;;  %v2007_v10 = vld [vmem:[#allocation2 + $0x78] ss:$12 sps:$4 sm:$0xff]  }
  0x1f   : > { %1914 = vmatprep.subr.bf16.mxu1 %v2205_v0  ;;  %488 = vmatprep.subr.bf16.mxu0 %v2000_v5  ;;  %v2008_v11 = vld [vmem:[#allocation2 + $0x64] ss:$12 sps:$4 sm:$0xff]   ;;  %v2010_v12 = vld [vmem:[#allocation2 + $0x68] ss:$12 sps:$4 sm:$0xff]   ;;  %v2011_v13 = vld [vmem:[#allocation2 + $0x60] ss:$12 sps:$4 sm:$0xff]  }
  0x20   : > { %v2012_v14 = vld [vmem:[#allocation2 + $0x4c] ss:$12 sps:$4 sm:$0xff]   ;;  %v2014_v15 = vld [vmem:[#allocation2 + $0x50] ss:$12 sps:$4 sm:$0xff]   ;;  %v2015_v16 = vld [vmem:[#allocation2 + $0x48] ss:$12 sps:$4 sm:$0xff]  }
  0x21   : > { %s2728_s28 = smov (!%p311_p0, %s2259_s28), 1  ;;  %v2016_v17 = vld [vmem:[#allocation2 + $0x34] ss:$12 sps:$4 sm:$0xff]   ;;  %v2018_v18 = vld [vmem:[#allocation2 + $0x38] ss:$12 sps:$4 sm:$0xff]   ;;  %v2387_v55 = vshrl.u32 %v570_v54, 7 }
  0x22   : > { %1915 = vmatpush3.bf16.msra.mxu1 %v2002_v6  ;;  %489 = vmatpush1.bf16.msra.mxu0 %v2003_v7  ;;  %v2019_v19 = vld [vmem:[#allocation2 + $0x30] ss:$12 sps:$4 sm:$0xff]   ;;  %s1883_s15 = sshll.u32 %s2728_s28, 4  ;;  %v2022_v21 = vld [vmem:[#allocation2 + $0x20] ss:$12 sps:$4 sm:$0xff]   ;;  %s1884_s23 = sshll.u32 %s2728_s28, 5 }
  0x23   : > { %1916 = vmatprep.subr.bf16.mxu1 %v2205_v0  ;;  %490 = vmatprep.subr.bf16.mxu0 %v2004_v8  ;;  %v2020_v20 = vld [vmem:[#allocation2 + $0x1c] ss:$12 sps:$4 sm:$0xff]   ;;  %v2023_v22 = vld [vmem:[#allocation2 + $0x18] ss:$12 sps:$4 sm:$0xff]   ;;  %s315_s18 = scalar_lea.vmem %s2717_s0, %s1883_s15  ;;  %v2027_v25 = vld [vmem:[#allocation2] ss:$12 sps:$4 sm:$0xff]   ;;  %s320_s26 = scalar_lea.vmem %s2725_s8, %s1884_s23 }
  0x24   : > { %v2024_v23 = vld [vmem:[#allocation2 + $0x4] ss:$12 sps:$4 sm:$0xff]   ;;  %v2026_v24 = vld [vmem:[#allocation2 + $0x8] ss:$12 sps:$4 sm:$0xff]   ;;  %v2030_v28 = vld [vmem:[%s2720_s3 + $0xac] ss:$12 sps:$4 sm:$0xff]  }
  0x25   : > { %v322_v26 = vld [vmem:[%s315_s18] sm:$0xff]  ;;  %v323_v27 = vld [vmem:[%s315_s18 + $0x8] sm:$0xff]  ;;  %v2031_v29 = vld [vmem:[%s2720_s3 + $0xb0] ss:$12 sps:$4 sm:$0xff]   ;;  %v2390_v60 = vadd.s32 8, %v2387_v55  ;;  %vm580_vm1 = vcmp.lt.s32.totalorder %v2387_v55, 7 }
  0x26   : > { %1917 = vmatpush3.bf16.msra.mxu1 %v2006_v9  ;;  %491 = vmatpush1.bf16.msra.mxu0 %v2007_v10  ;;  %v357_v30 = vpack.c.bf16 %v323_v27, %v322_v26  ;;  %v2028_v31 = vld [vmem:[%s2720_s3 + $0xa8] ss:$12 sps:$4 sm:$0xff]   ;;  %v2035_v33 = vld [vmem:[%s2720_s3 + $0x98] ss:$12 sps:$4 sm:$0xff]   ;;  %v2032_v34 = vld [vmem:[%s2720_s3 + $0x90] ss:$12 sps:$4 sm:$0xff]  }
  0x27   : > { %1918 = vmatprep.subr.bf16.mxu1 %v2205_v0  ;;  %492 = vmatprep.subr.bf16.mxu0 %v2008_v11  ;;  %v2034_v32 = vld [vmem:[%s2720_s3 + $0x94] ss:$12 sps:$4 sm:$0xff]   ;;  %v2038_v35 = vld [vmem:[%s2720_s3 + $0x7c] ss:$12 sps:$4 sm:$0xff]   ;;  %v2036_v37 = vld [vmem:[%s2720_s3 + $0x78] ss:$12 sps:$4 sm:$0xff]  }
  0x28   : > { %v2039_v36 = vld [vmem:[%s2720_s3 + $0x80] ss:$12 sps:$4 sm:$0xff]   ;;  %v2042_v38 = vld [vmem:[%s2720_s3 + $0x64] ss:$12 sps:$4 sm:$0xff]   ;;  %v2043_v39 = vld [vmem:[%s2720_s3 + $0x68] ss:$12 sps:$4 sm:$0xff]  }
  0x29   : > { %v2040_v40 = vld [vmem:[%s2720_s3 + $0x60] ss:$12 sps:$4 sm:$0xff]   ;;  %v2044_v42 = vld [vmem:[%s2720_s3 + $0x48] ss:$12 sps:$4 sm:$0xff]   ;;  %v2047_v43 = vld [vmem:[%s2720_s3 + $0x50] ss:$12 sps:$4 sm:$0xff]  }
  0x2a   : > { %1919 = vmatpush3.bf16.msra.mxu1 %v2010_v12  ;;  %493 = vmatpush1.bf16.msra.mxu0 %v2011_v13  ;;  %v2046_v41 = vld [vmem:[%s2720_s3 + $0x4c] ss:$12 sps:$4 sm:$0xff]   ;;  %v2050_v44 = vld [vmem:[%s2720_s3 + $0x34] ss:$12 sps:$4 sm:$0xff]   ;;  %v2048_v45 = vld [vmem:[%s2720_s3 + $0x30] ss:$12 sps:$4 sm:$0xff]  }
  0x2b   : > { %1920 = vmatprep.subr.bf16.mxu1 %v2205_v0  ;;  %494 = vmatprep.subr.bf16.mxu0 %v2012_v14  ;;  %v2051_v46 = vld [vmem:[%s2720_s3 + $0x38] ss:$12 sps:$4 sm:$0xff]   ;;  %v2054_v47 = vld [vmem:[%s2720_s3 + $0x1c] ss:$12 sps:$4 sm:$0xff]   ;;  %v2055_v49 = vld [vmem:[%s2720_s3 + $0x20] ss:$12 sps:$4 sm:$0xff]  }
  0x2c   : > { %v2052_v48 = vld [vmem:[%s2720_s3 + $0x18] ss:$12 sps:$4 sm:$0xff]   ;;  %v2056_v51 = vld [vmem:[%s2720_s3] ss:$12 sps:$4 sm:$0xff]   ;;  %v2059_v52 = vld [vmem:[%s2720_s3 + $0x8] ss:$12 sps:$4 sm:$0xff]  }
  0x2d   : > { %v2058_v50 = vld [vmem:[%s2720_s3 + $0x4] ss:$12 sps:$4 sm:$0xff]   ;;  %v2062_v53 = vld [vmem:[%s2720_s3 + $0x16c] ss:$12 sps:$4 sm:$0xff]   ;;  %v1746_v62 = vld [vmem:[%s2719_s2] ss:$0 sm:$0xff] }
  0x2e   : > { %1921 = vmatpush3.bf16.msra.mxu1 %v2014_v15  ;;  %495 = vmatpush1.bf16.msra.mxu0 %v2015_v16  ;;  %vm575_vm2 = vcmp.lt.s32.totalorder %v2387_v55, 1  ;;  %vm591_vm3 = vcmp.gt.s32.totalorder %v2387_v55, 0  ;;  %vm598_vm4 = vcmp.lt.s32.totalorder %v2390_v60, 15  ;;  %v2070_v26 = vld [vmem:[%s2720_s3 + $0x13c] ss:$12 sps:$4 sm:$0xff]  }
  0x2f   : > { %1922 = vmatprep.subr.bf16.mxu1 %v2205_v0  ;;  %496 = vmatprep.subr.bf16.mxu0 %v2016_v17  ;;  %v2068_v27 = vld [vmem:[%s2720_s3 + $0x138] ss:$12 sps:$4 sm:$0xff]  }
  0x32   : > { %1923 = vmatpush3.bf16.msra.mxu1 %v2018_v18  ;;  %497 = vmatpush1.bf16.msra.mxu0 %v2019_v19 }
  0x33   : > { %1924 = vmatprep.subr.bf16.mxu1 %v2205_v0  ;;  %498 = vmatprep.subr.bf16.mxu0 %v2020_v20  ;;  %v2060_v20 = vld [vmem:[%s2720_s3 + $0x168] ss:$12 sps:$4 sm:$0xff]  }
  0x36   : > { %1925 = vmatpush3.bf16.msra.mxu1 %v2022_v21  ;;  %499 = vmatpush1.bf16.msra.mxu0 %v2023_v22  ;;  %v2063_v21 = vld [vmem:[%s2720_s3 + $0x170] ss:$12 sps:$4 sm:$0xff]  }
  0x37   : > { %1926 = vmatprep.subr.bf16.mxu1 %v2205_v0  ;;  %500 = vmatprep.subr.bf16.mxu0 %v2024_v23  ;;  %v2066_v23 = vld [vmem:[%s2720_s3 + $0x154] ss:$12 sps:$4 sm:$0xff]  }
  0x3a   : > { %1927 = vmatpush3.bf16.msra.mxu1 %v2026_v24  ;;  %501 = vmatpush1.bf16.msra.mxu0 %v2027_v25  ;;  %v2064_v24 = vld [vmem:[%s2720_s3 + $0x150] ss:$12 sps:$4 sm:$0xff]   ;;  %v2067_v25 = vld [vmem:[%s2720_s3 + $0x158] ss:$12 sps:$4 sm:$0xff]  }
  0x3b   : > { %1932 = vmatprep.subr.bf16.mxu1 %v2205_v0  ;;  %765 = vmatprep.subr.bf16.mxu0 %v2030_v28  ;;  %v2071_v28 = vld [vmem:[%s2720_s3 + $0x140] ss:$12 sps:$4 sm:$0xff]  }
  0x3d   : > { %1929 = vmatmul.mubr.bf16.vlgmr.msra.gmra.mxu1 %v357_v30  ;;  %519 = vmatmul.mubr.bf16.vlgmr.msra.gmra.mxu0 %v357_v30  ;;  %v2072_v30 = vld [vmem:[%s2720_s3 + $0x120] ss:$12 sps:$4 sm:$0xff]  }
  0x3e   : > { %1933 = vmatpush3.bf16.msra.mxu1 %v2031_v29  ;;  %766 = vmatpush1.bf16.msra.mxu0 %v2028_v31  ;;  %v2074_v29 = vld [vmem:[%s2720_s3 + $0x124] ss:$12 sps:$4 sm:$0xff]   ;;  %v2075_v31 = vld [vmem:[%s2720_s3 + $0x128] ss:$12 sps:$4 sm:$0xff]  }
  0x3f   : > { %1934 = vmatprep.subr.bf16.mxu1 %v2205_v0  ;;  %767 = vmatprep.subr.bf16.mxu0 %v2034_v32  ;;  %v2078_v32 = vld [vmem:[%s2720_s3 + $0x10c] ss:$12 sps:$4 sm:$0xff]  }
  0x40   : > { %797 = vmatprep.mubr.bf16.mxu0 %v2207_v1  ;;  %1948 = vmatprep.mubr.msk.bf16.mxu1 %vm2206_vm0, %v2205_v0 }
  0x42   : > { %1935 = vmatpush3.bf16.msra.mxu1 %v2035_v33  ;;  %768 = vmatpush1.bf16.msra.mxu0 %v2032_v34  ;;  %v2076_v33 = vld [vmem:[%s2720_s3 + $0x108] ss:$12 sps:$4 sm:$0xff]   ;;  %v2079_v34 = vld [vmem:[%s2720_s3 + $0x110] ss:$12 sps:$4 sm:$0xff]  }
  0x43   : > { %1936 = vmatprep.subr.bf16.mxu1 %v2205_v0  ;;  %769 = vmatprep.subr.bf16.mxu0 %v2038_v35  ;;  %v2082_v35 = vld [vmem:[%s2720_s3 + $0xf4] ss:$12 sps:$4 sm:$0xff]  }
  0x46   : > { %1937 = vmatpush3.bf16.msra.mxu1 %v2039_v36  ;;  %770 = vmatpush1.bf16.msra.mxu0 %v2036_v37  ;;  %v2080_v36 = vld [vmem:[%s2720_s3 + $0xf0] ss:$12 sps:$4 sm:$0xff]   ;;  %v2083_v37 = vld [vmem:[%s2720_s3 + $0xf8] ss:$12 sps:$4 sm:$0xff]  }
  0x47   : > { %1938 = vmatprep.subr.bf16.mxu1 %v2205_v0  ;;  %771 = vmatprep.subr.bf16.mxu0 %v2042_v38  ;;  %v2086_v38 = vld [vmem:[%s2720_s3 + $0xdc] ss:$12 sps:$4 sm:$0xff]  }
  0x4a   : > { %1939 = vmatpush3.bf16.msra.mxu1 %v2043_v39  ;;  %772 = vmatpush1.bf16.msra.mxu0 %v2040_v40  ;;  %v2084_v39 = vld [vmem:[%s2720_s3 + $0xd8] ss:$12 sps:$4 sm:$0xff]   ;;  %v2087_v40 = vld [vmem:[%s2720_s3 + $0xe0] ss:$12 sps:$4 sm:$0xff]  }
  0x4b   : > { %1940 = vmatprep.subr.bf16.mxu1 %v2205_v0  ;;  %773 = vmatprep.subr.bf16.mxu0 %v2046_v41  ;;  %v2090_v41 = vld [vmem:[%s2720_s3 + $0xc4] ss:$12 sps:$4 sm:$0xff]  }
  0x4e   : > { %774 = vmatpush1.bf16.msra.mxu0 %v2044_v42  ;;  %1941 = vmatpush3.bf16.msra.mxu1 %v2047_v43  ;;  %v2088_v42 = vld [vmem:[%s2720_s3 + $0xc0] ss:$12 sps:$4 sm:$0xff]   ;;  %v2091_v43 = vld [vmem:[%s2720_s3 + $0xc8] ss:$12 sps:$4 sm:$0xff]  }
  0x4f   : > { %1942 = vmatprep.subr.bf16.mxu1 %v2205_v0  ;;  %775 = vmatprep.subr.bf16.mxu0 %v2050_v44  ;;  %v2094_v44 = vld [vmem:[%s2723_s6 + $0x154] ss:$24 sps:$4 sm:$0xff]  }
  0x52   : > { %776 = vmatpush1.bf16.msra.mxu0 %v2048_v45  ;;  %1943 = vmatpush3.bf16.msra.mxu1 %v2051_v46  ;;  %v2097_v45 = vld [vmem:[%s2723_s6 + $0x15c] ss:$24 sps:$4 sm:$0xff]  }
  0x53   : > { %1944 = vmatprep.subr.bf16.mxu1 %v2205_v0  ;;  %777 = vmatprep.subr.bf16.mxu0 %v2054_v47 }
  0x56   : > { %778 = vmatpush1.bf16.msra.mxu0 %v2052_v48  ;;  %1945 = vmatpush3.bf16.msra.mxu1 %v2055_v49  ;;  %v1771_v49 = vld [vmem:[%s2721_s4] ss:$0 sm:$0xff] }
  0x57   : > { %1946 = vmatprep.subr.bf16.mxu1 %v2205_v0  ;;  %779 = vmatprep.subr.bf16.mxu0 %v2058_v50 }
  0x5a   : > { %780 = vmatpush1.bf16.msra.mxu0 %v2056_v51  ;;  %1947 = vmatpush3.bf16.msra.mxu1 %v2059_v52 }
  0x5b   : > { %1952 = vmatprep.subr.bf16.mxu1 %v2205_v0  ;;  %1050 = vmatprep.subr.bf16.mxu0 %v2062_v53 }
  0xfd   : > { %v563_v56 = vpop.f32.mrf.mxu1  ;;  %v520_v57 = vpop.f32.mrf.mxu0 }
  0xfe   : > { %v578_v61 = vrot.slane %v563_v56, 1  ;;  %v573_v4 = vrot.slane %v520_v57, 7 }
  0xff   : > { %v1930_v58 = vpop.f32.mrf.mxu1  ;;  %v522_v59 = vpop.f32.mrf.mxu0 }
 0x100   : > { %v589_v7 = vadd.f32 %v1746_v62, %v522_v59 }
 0x101   : > { %v566_v63 = vpop.f32.mrf.mxu1  ;;  %v524_v3 = vpop.f32.mrf.mxu0 }
 0x102   : > { %v579_v2 = vrot.slane %v566_v63, 1  ;;  %v574_v5 = vrot.slane %v524_v3, 7 }
 0x103   : > { %v1931_v6 = vpop.f32.mrf.mxu1  ;;  %v526_v8 = vpop.f32.mrf.mxu0 }
 0x104   : > { %v582_v9 = vsel %vm580_vm1, %v579_v2, %v578_v61  ;;  %v577_v10 = vsel %vm575_vm2, %v574_v5, %v573_v4  ;;  %v576_v11 = vsel %vm575_vm2, %v573_v4, %v574_v5  ;;  %v590_v12 = vadd.f32 %v1746_v62, %v526_v8 }
 0x105   : > { %v593_v13 = vsel %vm591_vm3, %v577_v10, 0.0  ;;  %v581_v16 = vsel %vm580_vm1, %v578_v61, %v579_v2  ;;  %v600_v17 = vsel %vm598_vm4, %v582_v9, 0.0 }
 0x106   : > { %v595_v14 = vadd.f32 %v593_v13, %v589_v7  ;;  %v596_v15 = vadd.f32 %v590_v12, %v576_v11  ;;  %v1772_v7 = vld [vmem:[%s2722_s5] ss:$0 sm:$0xff] }
 0x108   : > { %v2411_v18 = vadd.f32 %v595_v14, %v581_v16  ;;  %v2413_v19 = vadd.f32 %v600_v17, %v596_v15  ;;  %v2092_v15 = vld [vmem:[%s2723_s6 + $0x150] ss:$24 sps:$4 sm:$0xff]  }
 0x109   : > { %v2095_v16 = vld [vmem:[%s2723_s6 + $0x158] ss:$24 sps:$4 sm:$0xff]  }
 0x10a   : > { %v636_v22 = vpack.c.bf16 %v2413_v19, %v2411_v18 }
 0x10c   : > { %798 = vmatmul.mubr.bf16.vlgmr.msra.gmra.mxu0 %v636_v22  ;;  %1949 = vmatmul.mubr.bf16.vlgmr.msra.gmra.mxu1 %v636_v22  ;;  %v2098_v22 = vld [vmem:[%s2723_s6 + $0x120] ss:$24 sps:$4 sm:$0xff]  }
 0x10d   : > { %1051 = vmatpush1.bf16.msra.mxu0 %v2060_v20  ;;  %1953 = vmatpush3.bf16.msra.mxu1 %v2063_v21  ;;  %v2100_v20 = vld [vmem:[%s2723_s6 + $0x124] ss:$24 sps:$4 sm:$0xff]  }
 0x10e   : > { %1052 = vmatprep.subr.bf16.mxu0 %v2066_v23  ;;  %1954 = vmatprep.subr.bf16.mxu1 %v2205_v0  ;;  %v2103_v21 = vld [vmem:[%s2723_s6 + $0x12c] ss:$24 sps:$4 sm:$0xff]   ;;  %v2101_v23 = vld [vmem:[%s2723_s6 + $0x128] ss:$24 sps:$4 sm:$0xff]  }
 0x10f   : > { %1082 = vmatprep.mubr.bf16.mxu0 %v2207_v1  ;;  %1968 = vmatprep.mubr.msk.bf16.mxu1 %vm2206_vm0, %v2205_v0 }
 0x111   : > { %1053 = vmatpush1.bf16.msra.mxu0 %v2064_v24  ;;  %1955 = vmatpush3.bf16.msra.mxu1 %v2067_v25  ;;  %v2106_v24 = vld [vmem:[%s2723_s6 + $0xf4] ss:$24 sps:$4 sm:$0xff]  }
 0x112   : > { %1054 = vmatprep.subr.bf16.mxu0 %v2070_v26  ;;  %1956 = vmatprep.subr.bf16.mxu1 %v2205_v0  ;;  %v2109_v25 = vld [vmem:[%s2723_s6 + $0xfc] ss:$24 sps:$4 sm:$0xff]   ;;  %v2104_v26 = vld [vmem:[%s2723_s6 + $0xf0] ss:$24 sps:$4 sm:$0xff]  }
 0x115   : > { %1055 = vmatpush1.bf16.msra.mxu0 %v2068_v27  ;;  %1957 = vmatpush3.bf16.msra.mxu1 %v2071_v28  ;;  %v2107_v27 = vld [vmem:[%s2723_s6 + $0xf8] ss:$24 sps:$4 sm:$0xff]   ;;  %v2112_v28 = vld [vmem:[%s2723_s6 + $0xc4] ss:$24 sps:$4 sm:$0xff]  }
 0x116   : > { %1056 = vmatprep.subr.bf16.mxu0 %v2074_v29  ;;  %1958 = vmatprep.subr.bf16.mxu1 %v2205_v0  ;;  %v2110_v29 = vld [vmem:[%s2723_s6 + $0xc0] ss:$24 sps:$4 sm:$0xff]  }
 0x119   : > { %1057 = vmatpush1.bf16.msra.mxu0 %v2072_v30  ;;  %1959 = vmatpush3.bf16.msra.mxu1 %v2075_v31  ;;  %v2115_v30 = vld [vmem:[%s2723_s6 + $0xcc] ss:$24 sps:$4 sm:$0xff]   ;;  %v2113_v31 = vld [vmem:[%s2723_s6 + $0xc8] ss:$24 sps:$4 sm:$0xff]  }
 0x11a   : > { %1960 = vmatprep.subr.bf16.mxu1 %v2205_v0  ;;  %1058 = vmatprep.subr.bf16.mxu0 %v2078_v32  ;;  %v2118_v32 = vld [vmem:[%s2723_s6 + $0x94] ss:$24 sps:$4 sm:$0xff]  }
 0x11d   : > { %1059 = vmatpush1.bf16.msra.mxu0 %v2076_v33  ;;  %1961 = vmatpush3.bf16.msra.mxu1 %v2079_v34  ;;  %v2116_v33 = vld [vmem:[%s2723_s6 + $0x90] ss:$24 sps:$4 sm:$0xff]   ;;  %v2121_v34 = vld [vmem:[%s2723_s6 + $0x9c] ss:$24 sps:$4 sm:$0xff]  }
 0x11e   : > { %1962 = vmatprep.subr.bf16.mxu1 %v2205_v0  ;;  %1060 = vmatprep.subr.bf16.mxu0 %v2082_v35  ;;  %v2119_v35 = vld [vmem:[%s2723_s6 + $0x98] ss:$24 sps:$4 sm:$0xff]  }
 0x121   : > { %1061 = vmatpush1.bf16.msra.mxu0 %v2080_v36  ;;  %1963 = vmatpush3.bf16.msra.mxu1 %v2083_v37  ;;  %v2124_v36 = vld [vmem:[%s2723_s6 + $0x64] ss:$24 sps:$4 sm:$0xff]   ;;  %v2122_v37 = vld [vmem:[%s2723_s6 + $0x60] ss:$24 sps:$4 sm:$0xff]  }
 0x122   : > { %1964 = vmatprep.subr.bf16.mxu1 %v2205_v0  ;;  %1062 = vmatprep.subr.bf16.mxu0 %v2086_v38  ;;  %v2127_v38 = vld [vmem:[%s2723_s6 + $0x6c] ss:$24 sps:$4 sm:$0xff]  }
 0x125   : > { %1063 = vmatpush1.bf16.msra.mxu0 %v2084_v39  ;;  %1965 = vmatpush3.bf16.msra.mxu1 %v2087_v40  ;;  %v2125_v39 = vld [vmem:[%s2723_s6 + $0x68] ss:$24 sps:$4 sm:$0xff]   ;;  %v2130_v40 = vld [vmem:[%s2723_s6 + $0x34] ss:$24 sps:$4 sm:$0xff]  }
 0x126   : > { %1966 = vmatprep.subr.bf16.mxu1 %v2205_v0  ;;  %1064 = vmatprep.subr.bf16.mxu0 %v2090_v41  ;;  %v2128_v41 = vld [vmem:[%s2723_s6 + $0x30] ss:$24 sps:$4 sm:$0xff]  }
 0x129   : > { %1065 = vmatpush1.bf16.msra.mxu0 %v2088_v42  ;;  %1967 = vmatpush3.bf16.msra.mxu1 %v2091_v43  ;;  %v2133_v42 = vld [vmem:[%s2723_s6 + $0x3c] ss:$24 sps:$4 sm:$0xff]   ;;  %v2131_v43 = vld [vmem:[%s2723_s6 + $0x38] ss:$24 sps:$4 sm:$0xff]  }
 0x12a   : > { %1464 = vmatprep.subr.bf16.mxu0 %v2094_v44  ;;  %1507 = vmatprep.subr.bf16.mxu1 %v2097_v45  ;;  %v2136_v44 = vld [vmem:[%s2723_s6 + $0x4] ss:$24 sps:$4 sm:$0xff]   ;;  %v2134_v45 = vld [vmem:[%s2723_s6] ss:$24 sps:$4 sm:$0xff]  }
 0x1cc   : > { %v799_v0 = vpop.f32.mrf.mxu0  ;;  %v842_v46 = vpop.f32.mrf.mxu1 }
 0x1cd   : > { %v849_v52 = vrot.slane %v799_v0, 7  ;;  %v853_v56 = vrot.slane %v842_v46, 1  ;;  %v2139_v0 = vld [vmem:[%s2723_s6 + $0xc] ss:$24 sps:$4 sm:$0xff]   ;;  %v2137_v46 = vld [vmem:[%s2723_s6 + $0x8] ss:$24 sps:$4 sm:$0xff]  }
 0x1ce   : > { %v801_v47 = vpop.f32.mrf.mxu0  ;;  %v1950_v48 = vpop.f32.mrf.mxu1 }
 0x1cf   : > { %v863_v59 = vadd.f32 %v1771_v49, %v801_v47  ;;  %v2142_v47 = vld [vmem:[%s2723_s6 + $0x164] ss:$24 sps:$4 sm:$0xff]  }
 0x1d0   : > { %v803_v50 = vpop.f32.mrf.mxu0  ;;  %v845_v51 = vpop.f32.mrf.mxu1 }
 0x1d1   : > { %v850_v53 = vrot.slane %v803_v50, 7  ;;  %v854_v54 = vrot.slane %v845_v51, 1 }
 0x1d2   : > { %v805_v57 = vpop.f32.mrf.mxu0  ;;  %v1951_v58 = vpop.f32.mrf.mxu1 }
 0x1d3   : > { %v852_v61 = vsel %vm575_vm2, %v850_v53, %v849_v52  ;;  %v851_v62 = vsel %vm575_vm2, %v849_v52, %v850_v53  ;;  %v856_v2 = vsel %vm580_vm1, %v854_v54, %v853_v56  ;;  %v864_v3 = vadd.f32 %v1771_v49, %v805_v57  ;;  %v1830_v52 = vld [vmem:[%s2721_s4 + $0x1] ss:$0 sm:$0xff] }
 0x1d4   : > { %v865_v63 = vsel %vm591_vm3, %v852_v61, 0.0  ;;  %v855_v5 = vsel %vm580_vm1, %v853_v56, %v854_v54  ;;  %v870_v9 = vsel %vm598_vm4, %v856_v2, 0.0 }
 0x1d5   : > { %v867_v4 = vadd.f32 %v865_v63, %v863_v59  ;;  %v868_v6 = vadd.f32 %v864_v3, %v851_v62 }
 0x1d7   : > { %v871_v8 = vadd.f32 %v867_v4, %v855_v5  ;;  %v872_v10 = vadd.f32 %v870_v9, %v868_v6 }
 0x1d9   : > { %vm873_vm5 = vcmp.gt.f32.partialorder %v871_v8, 0.0  ;;  %v882_v11 = vmul.f32 %v1772_v7, %v871_v8  ;;  %vm874_vm6 = vcmp.gt.f32.partialorder %v872_v10, 0.0  ;;  %v883_v12 = vmul.f32 %v1772_v7, %v872_v10 }
 0x1db   : > { %v884_v13 = vsel %vm873_vm5, %v871_v8, %v882_v11  ;;  %v885_v14 = vsel %vm874_vm6, %v872_v10, %v883_v12  ;;  %v1832_v10 = vld [vmem:[%s2722_s5 + $0x1] ss:$0 sm:$0xff] }
 0x1dc   : > { %v921_v17 = vpack.c.bf16 %v885_v14, %v884_v13 }
 0x1de   : > { %1083 = vmatmul.mubr.bf16.vlgmr.msra.gmra.mxu0 %v921_v17  ;;  %1969 = vmatmul.mubr.bf16.vlgmr.msra.gmra.mxu1 %v921_v17 }
 0x1df   : > { %1465 = vmatpush1.bf16.msra.mxu0 %v2092_v15  ;;  %1508 = vmatpush1.bf16.msra.mxu1 %v2095_v16 }
 0x1e0   : > { %1466 = vmatprep.subr.bf16.mxu0 %v2100_v20  ;;  %1509 = vmatprep.subr.bf16.mxu1 %v2103_v21 }
 0x1e1   : > { %1496 = vmatprep.mubr.bf16.mxu0 %v2207_v1  ;;  %1539 = vmatprep.mubr.bf16.mxu1 %v2207_v1 }
 0x1e3   : > { %1467 = vmatpush1.bf16.msra.mxu0 %v2098_v22  ;;  %1510 = vmatpush1.bf16.msra.mxu1 %v2101_v23  ;;  %v2140_v22 = vld [vmem:[%s2723_s6 + $0x160] ss:$24 sps:$4 sm:$0xff]  }
 0x1e4   : > { %1468 = vmatprep.subr.bf16.mxu0 %v2106_v24  ;;  %1511 = vmatprep.subr.bf16.mxu1 %v2109_v25  ;;  %v2145_v24 = vld [vmem:[%s2723_s6 + $0x134] ss:$24 sps:$4 sm:$0xff]   ;;  %v2143_v25 = vld [vmem:[%s2723_s6 + $0x130] ss:$24 sps:$4 sm:$0xff]  }
 0x1e7   : > { %1469 = vmatpush1.bf16.msra.mxu0 %v2104_v26  ;;  %1512 = vmatpush1.bf16.msra.mxu1 %v2107_v27  ;;  %v2151_v26 = vld [vmem:[%s2723_s6 + $0xd4] ss:$24 sps:$4 sm:$0xff]   ;;  %v2154_v27 = vld [vmem:[%s2723_s6 + $0xa4] ss:$24 sps:$4 sm:$0xff]  }
 0x1e8   : > { %1470 = vmatprep.subr.bf16.mxu0 %v2112_v28  ;;  %1513 = vmatprep.subr.bf16.mxu1 %v2115_v30  ;;  %v2152_v28 = vld [vmem:[%s2723_s6 + $0xa0] ss:$24 sps:$4 sm:$0xff]   ;;  %v2155_v30 = vld [vmem:[%s2723_s6 + $0x70] ss:$24 sps:$4 sm:$0xff]  }
 0x1eb   : > { %1471 = vmatpush1.bf16.msra.mxu0 %v2110_v29  ;;  %1514 = vmatpush1.bf16.msra.mxu1 %v2113_v31  ;;  %v2157_v29 = vld [vmem:[%s2723_s6 + $0x74] ss:$24 sps:$4 sm:$0xff]   ;;  %v2160_v31 = vld [vmem:[%s2723_s6 + $0x44] ss:$24 sps:$4 sm:$0xff]  }
 0x1ec   : > { %1472 = vmatprep.subr.bf16.mxu0 %v2118_v32  ;;  %1515 = vmatprep.subr.bf16.mxu1 %v2121_v34  ;;  %v2158_v32 = vld [vmem:[%s2723_s6 + $0x40] ss:$24 sps:$4 sm:$0xff]   ;;  %v2161_v34 = vld [vmem:[%s2723_s6 + $0x10] ss:$24 sps:$4 sm:$0xff]  }
 0x1ef   : > { %1473 = vmatpush1.bf16.msra.mxu0 %v2116_v33  ;;  %1516 = vmatpush1.bf16.msra.mxu1 %v2119_v35  ;;  %v2163_v33 = vld [vmem:[%s2723_s6 + $0x14] ss:$24 sps:$4 sm:$0xff]  }
 0x1f0   : > { %1474 = vmatprep.subr.bf16.mxu0 %v2124_v36  ;;  %1517 = vmatprep.subr.bf16.mxu1 %v2127_v38 }
 0x1f3   : > { %1475 = vmatpush1.bf16.msra.mxu0 %v2122_v37  ;;  %1518 = vmatpush1.bf16.msra.mxu1 %v2125_v39 }
 0x1f4   : > { %1476 = vmatprep.subr.bf16.mxu0 %v2130_v40  ;;  %1519 = vmatprep.subr.bf16.mxu1 %v2133_v42 }
 0x1f7   : > { %1477 = vmatpush1.bf16.msra.mxu0 %v2128_v41  ;;  %1520 = vmatpush1.bf16.msra.mxu1 %v2131_v43  ;;  %v1612_v41 = vsub.s32 0, %v2387_v55  ;;  %v1222_v43 = vld [vmem:[%s2724_s7] sm:$0x3] }
 0x1f8   : > { %1478 = vmatprep.subr.bf16.mxu0 %v2136_v44  ;;  %1521 = vmatprep.subr.bf16.mxu1 %v2139_v0 }
 0x1fb   : > { %1479 = vmatpush1.bf16.msra.mxu0 %v2134_v45  ;;  %1522 = vmatpush1.bf16.msra.mxu1 %v2137_v46  ;;  %v1616_v45 = vsub.s32 1, %v2387_v55 }
 0x1fc   : > { %1550 = vmatprep.subr.bf16.mxu0 %v2142_v47  ;;  %v1613_v47 = vrot.slane %v1222_v43, %v1612_v41 }
 0x29e   : > { %v1084_v48 = vpop.f32.mrf.mxu0  ;;  %v1127_v49 = vpop.f32.mrf.mxu1 }
 0x29f   : > { %v1134_v56 = vrot.slane %v1084_v48, 7  ;;  %v1138_v59 = vrot.slane %v1127_v49, 1 }
 0x2a0   : > { %v1086_v50 = vpop.f32.mrf.mxu0  ;;  %v1970_v51 = vpop.f32.mrf.mxu1 }
 0x2a1   : > { %v1148_v63 = vadd.f32 %v1830_v52, %v1086_v50  ;;  %v1617_v51 = vrot.slane %v1222_v43, %v1616_v45 }
 0x2a2   : > { %v1088_v53 = vpop.f32.mrf.mxu0  ;;  %v1130_v54 = vpop.f32.mrf.mxu1 }
 0x2a3   : > { %v1135_v57 = vrot.slane %v1088_v53, 7  ;;  %v1139_v58 = vrot.slane %v1130_v54, 1 }
 0x2a4   : > { %v1090_v61 = vpop.f32.mrf.mxu0  ;;  %v1971_v62 = vpop.f32.mrf.mxu1 }
 0x2a5   : > { %v1137_v2 = vsel %vm575_vm2, %v1135_v57, %v1134_v56  ;;  %v1136_v3 = vsel %vm575_vm2, %v1134_v56, %v1135_v57  ;;  %v1141_v5 = vsel %vm580_vm1, %v1139_v58, %v1138_v59  ;;  %v1149_v6 = vadd.f32 %v1830_v52, %v1090_v61 }
 0x2a6   : > { %v1150_v4 = vsel %vm591_vm3, %v1137_v2, 0.0  ;;  %v1140_v8 = vsel %vm580_vm1, %v1138_v59, %v1139_v58  ;;  %v1155_v12 = vsel %vm598_vm4, %v1141_v5, 0.0 }
 0x2a7   : > { %v1152_v7 = vadd.f32 %v1150_v4, %v1148_v63  ;;  %v1153_v9 = vadd.f32 %v1149_v6, %v1136_v3 }
 0x2a9   : > { %v1156_v11 = vadd.f32 %v1152_v7, %v1140_v8  ;;  %v1157_v13 = vadd.f32 %v1155_v12, %v1153_v9 }
 0x2ab   : > { %vm1158_vm7 = vcmp.gt.f32.partialorder %v1156_v11, 0.0  ;;  %v1168_v14 = vmul.f32 %v1832_v10, %v1156_v11  ;;  %vm1159_vm8 = vcmp.gt.f32.partialorder %v1157_v13, 0.0  ;;  %v1169_v15 = vmul.f32 %v1832_v10, %v1157_v13 }
 0x2ad   : > { %v1170_v16 = vsel %vm1158_vm7, %v1156_v11, %v1168_v14  ;;  %v1171_v17 = vsel %vm1159_vm8, %v1157_v13, %v1169_v15 }
 0x2ae   : > { %v1172_v20 = vadd.f32 %v1170_v16, %v2411_v18  ;;  %v1173_v21 = vadd.f32 %v1171_v17, %v2413_v19  ;;  %v2148_v18 = vld [vmem:[%s2723_s6 + $0x104] ss:$24 sps:$4 sm:$0xff]   ;;  %v2146_v19 = vld [vmem:[%s2723_s6 + $0x100] ss:$24 sps:$4 sm:$0xff]  }
 0x2b0   : > { %v1223_v23 = vpack.c.bf16 %v1173_v21, %v1172_v20 }
 0x2b2   : > { %1497 = vmatmul.mubr.bf16.vlgmr.msra.gmra.mxu0 %v1223_v23  ;;  %1540 = vmatmul.mubr.bf16.vlgmr.msra.gmra.mxu1 %v1223_v23 }
 0x2b3   : > { %1551 = vmatpush1.bf16.msra.mxu0 %v2140_v22  ;;  %1582 = vmatprep.mubr.bf16.mxu0 %v2207_v1  ;;  %v2149_v1 = vld [vmem:[%s2723_s6 + $0xd0] ss:$24 sps:$4 sm:$0xff]  }
 0x2b4   : > { %1552 = vmatprep.subr.bf16.mxu0 %v2145_v24 }
 0x2b7   : > { %1553 = vmatpush1.bf16.msra.mxu0 %v2143_v25 }
 0x2b8   : > { %1554 = vmatprep.subr.bf16.mxu0 %v2148_v18 }
 0x2bb   : > { %1555 = vmatpush1.bf16.msra.mxu0 %v2146_v19 }
 0x2bc   : > { %1556 = vmatprep.subr.bf16.mxu0 %v2151_v26 }
 0x2bf   : > { %1557 = vmatpush1.bf16.msra.mxu0 %v2149_v1 }
 0x2c0   : > { %1558 = vmatprep.subr.bf16.mxu0 %v2154_v27 }
 0x2c3   : > { %1559 = vmatpush1.bf16.msra.mxu0 %v2152_v28 }
 0x2c4   : > { %1560 = vmatprep.subr.bf16.mxu0 %v2157_v29 }
 0x2c7   : > { %1561 = vmatpush1.bf16.msra.mxu0 %v2155_v30 }
 0x2c8   : > { %1562 = vmatprep.subr.bf16.mxu0 %v2160_v31 }
 0x2cb   : > { %1563 = vmatpush1.bf16.msra.mxu0 %v2158_v32 }
 0x2cc   : > { %1564 = vmatprep.subr.bf16.mxu0 %v2163_v33 }
 0x2cf   : > { %1565 = vmatpush1.bf16.msra.mxu0 %v2161_v34 }
 0x2d2   : > { %1583 = vmatmul.mubr.bf16.vlgmr.msra.gmra.mxu0 %v1223_v23 }
 0x372   : > { %v1498_v35 = vpop.f32.mrf.mxu0  ;;  %v1541_v37 = vpop.f32.mrf.mxu1 }
 0x373   : > { %v1593_v44 = vrot.slane %v1498_v35, 7  ;;  %v1620_v59 = vadd.f32 %v1613_v47, %v1541_v37 }
 0x374   : > { %v1500_v36 = vpop.f32.mrf.mxu0  ;;  %v1543_v39 = vpop.f32.mrf.mxu1 }
 0x375   : > { %v1594_v48 = vrot.slane %v1500_v36, 7  ;;  %v1621_v4 = vadd.f32 %v1617_v51, %v1543_v39 }
 0x376   : > { %v1502_v38 = vpop.f32.mrf.mxu0  ;;  %v1545_v0 = vpop.f32.mrf.mxu1 }
 0x377   : > { %v1595_v42 = vrot.slane %v1502_v38, 7  ;;  %v1622_v52 = vadd.f32 %v1613_v47, %v1545_v0 }
 0x378   : > { %v1504_v40 = vpop.f32.mrf.mxu0  ;;  %v1547_v54 = vpop.f32.mrf.mxu1 }
 0x379   : > { %v1596_v46 = vrot.slane %v1504_v40, 7  ;;  %v1599_v49 = vsel %vm575_vm2, %v1595_v42, %v1593_v44  ;;  %v1597_v58 = vsel %vm575_vm2, %v1593_v44, %v1595_v42  ;;  %v1623_v63 = vadd.f32 %v1617_v51, %v1547_v54 }
 0x37a   : > { %v1624_v57 = vsel %vm591_vm3, %v1599_v49, 0.0  ;;  %v1630_v6 = vadd.f32 %v1622_v52, %v1597_v58 }
 0x37b   : > { %v1600_v53 = vsel %vm575_vm2, %v1596_v46, %v1594_v48  ;;  %v1628_v5 = vadd.f32 %v1624_v57, %v1620_v59  ;;  %v1598_v7 = vsel %vm575_vm2, %v1594_v48, %v1596_v46 }
 0x37c   : > { %v1625_v62 = vsel %vm591_vm3, %v1600_v53, 0.0  ;;  %v1631_v16 = vadd.f32 %v1623_v63, %v1598_v7 }
 0x37d   : > { %v1629_v13 = vadd.f32 %v1625_v62, %v1621_v4 }
 0x392   : > { %v1584_v50 = vpop.f32.mrf.mxu0 }
 0x393   : > { %v1601_v2 = vrot.slane %v1584_v50, 1 }
 0x394   : > { %v1586_v56 = vpop.f32.mrf.mxu0 }
 0x395   : > { %v1602_v9 = vrot.slane %v1586_v56, 1 }
 0x396   : > { %v1588_v61 = vpop.f32.mrf.mxu0 }
 0x397   : > { %v1603_v3 = vrot.slane %v1588_v61, 1 }
 0x398   : > { %v1590_v8 = vpop.f32.mrf.mxu0 }
 0x399   : > { %v1605_v10 = vsel %vm580_vm1, %v1601_v2, %v1603_v3  ;;  %v1607_v11 = vsel %vm580_vm1, %v1603_v3, %v1601_v2  ;;  %v1604_v12 = vrot.slane %v1590_v8, 1 }
 0x39a   : > { %v1634_v14 = vsel %vm598_vm4, %v1607_v11, 0.0  ;;  %v1636_v15 = vadd.f32 %v1628_v5, %v1605_v10 }
 0x39b   : > { %v1638_v17 = vadd.f32 %v1634_v14, %v1630_v6  ;;  %v1606_v20 = vsel %vm580_vm1, %v1602_v9, %v1604_v12  ;;  %v1608_v21 = vsel %vm580_vm1, %v1604_v12, %v1602_v9 }
 0x39c   : > { %1640 = vst [vmem:[%s320_s26] sm:$0xff] %v1636_v15  ;;  %v1635_v22 = vsel %vm598_vm4, %v1608_v21, 0.0  ;;  %v1637_v23 = vadd.f32 %v1629_v13, %v1606_v20 }
 0x39d   : > { %1642 = vst [vmem:[%s320_s26 + $0x10] sm:$0xff] %v1638_v17  ;;  %v1639_v24 = vadd.f32 %v1635_v22, %v1631_v16 }
 0x39e   : > { %1641 = vst [vmem:[%s320_s26 + $0x8] sm:$0xff] %v1637_v23 }
 0x39f   : > { %1643 = vst [vmem:[%s320_s26 + $0x18] sm:$0xff] %v1639_v24 }
 0x3a0 PF: > { %s19_s27 = sadd.s32 1, %s2200_s27  }
 0x3a1   : > { %p16_p1 = scmp.ge.s32.totalorder %s19_s27, 4  }
 0x3a3   :  { %18 = sbr.rel (!%p16_p1) target bundleno = 1 (0x1), region = 90 }
 0x3a8   :  { %1665 = vsyncpa [#allocation3], 1 }
 0x3a9   :  { %1667 = vsyncpa [#allocation3 + $0x1], 1 }

</bundles_post_ra>
